<compile_context>
chip_gen: v7x
topology: tpu7x:2x2x1
jax: 0.10.0
libtpu: 0.0.40
codegen_flags: <defaults>
</compile_context>

<pallas_src>
import functools

import jax
import jax.numpy as jnp
from jax import lax
from jax.experimental import pallas as pl
from jax.experimental.pallas import tpu as pltpu

_EPS = 1e-5  # torch LayerNorm default for f32


def _prenorm_kernel(x_ref, w_ref, b_ref, o_ref, *, dot_dtype):
    """One (C, TILE_HW) spatial tile of one batch element.

    x_ref : (C, T) f32  activations (channels on sublanes, spatial on lanes)
    w_ref : (C, C) f32  1x1-conv weight with the LayerNorm gain pre-folded in
    b_ref : (C, 1) f32  1x1-conv bias
    o_ref : (C, T)      output tile
    """
    x = x_ref[...]
    c = x.shape[0]
    inv_c = jnp.float32(1.0 / c)

    # Single-pass moments over the channel axis (axis 0).
    s1 = jnp.sum(x, axis=0, keepdims=True)          # (1, T)
    s2 = jnp.sum(x * x, axis=0, keepdims=True)      # (1, T)
    mean = s1 * inv_c
    var = jnp.maximum(s2 * inv_c - mean * mean, 0.0)
    normed = (x - mean) * lax.rsqrt(var + _EPS)

    w = w_ref[...]
    if dot_dtype is not None:
        # Feed the MXU in bf16 (f32 accumulation); elementwise stats stay f32.
        normed = normed.astype(dot_dtype)
        w = w.astype(dot_dtype)

    out = jnp.dot(w, normed, preferred_element_type=jnp.float32)
    out = out + b_ref[...]                          # (C, 1) broadcast over lanes
    o_ref[...] = out.astype(o_ref.dtype)


def _pick_tile_hw(hw: int, cap: int) -> int:
    """Largest multiple of 128 that divides hw and is <= cap (else full hw)."""
    if hw % 128 != 0:
        return hw                      # full-extent block satisfies the (8,128) rule
    cap = min(cap, hw)
    cap -= cap % 128
    cap = max(cap, 128)
    for t in range(cap, 0, -128):
        if hw % t == 0:
            return t
    return hw


def prenorm(x, g, w, b, *, max_tile_hw=1024, matmul_dtype="auto", out_dtype=None):
    """Fused channel LayerNorm + 1x1 conv.

    x : (B, C, H, W) f32
    g : (C,) or (C, 1)   LayerNorm gain
    w : (C, C)           1x1-conv weight
    b : (C,) or (C, 1)   1x1-conv bias
    matmul_dtype : "auto" | None | dtype  — dtype of the MXU operands.
    """
    B, C, H, W = x.shape
    HW = H * W
    out_dtype = x.dtype if out_dtype is None else out_dtype

    # Fold the LayerNorm gain into the conv weight (one-time O(C^2) transform).
    w_folded = (w * jnp.reshape(g, (1, C))).astype(jnp.float32)
    b2 = jnp.reshape(b, (C, 1)).astype(jnp.float32)

    if matmul_dtype == "auto":
        # bf16 at the dot only pays once the kernel is MXU-bound (large C).
        dot_dtype = jnp.bfloat16 if C >= 256 else None
    else:
        dot_dtype = matmul_dtype

    tile = _pick_tile_hw(HW, max_tile_hw)
    n_tiles = HW // tile
    x3 = x.reshape(B, C, HW)

    # VMEM budget: double-buffered x/out tiles + (weight, bias) blocks + headroom.
    itemsize = 4
    vmem_bytes = 2 * 2 * C * tile * itemsize + 2 * (C * C + C) * itemsize
    vmem_limit = int(min(max(2 * vmem_bytes + (4 << 20), 16 << 20), 48 << 20))

    kernel = functools.partial(_prenorm_kernel, dot_dtype=dot_dtype)

    out3 = pl.pallas_call(
        kernel,
        out_shape=jax.ShapeDtypeStruct((B, C, HW), out_dtype),
        grid_spec=pltpu.PrefetchScalarGridSpec(
            num_scalar_prefetch=0,
            grid=(B, n_tiles),
            in_specs=[
                pl.BlockSpec((pl.Squeezed(), C, tile), lambda i, j: (i, 0, j)),
                pl.BlockSpec((C, C), lambda i, j: (0, 0)),
                pl.BlockSpec((C, 1), lambda i, j: (0, 0)),
            ],
            out_specs=pl.BlockSpec((pl.Squeezed(), C, tile), lambda i, j: (i, 0, j)),
        ),
        compiler_params=pltpu.CompilerParams(
            dimension_semantics=("parallel", "parallel"),
            vmem_limit_bytes=vmem_limit,
        ),
    )(x3, w_folded, b2)
    return out3.reshape(B, C, H, W)


def prenorm_ref(x, g, w, b):
    """Pure-JAX reference matching the PyTorch semantics (two-pass, unfolded g)."""
    mean = jnp.mean(x, axis=1, keepdims=True)
    var = jnp.mean((x - mean) ** 2, axis=1, keepdims=True)
    normed = (x - mean) * lax.rsqrt(var + _EPS) * jnp.reshape(g, (1, -1, 1, 1))
    return jnp.einsum("oc,bchw->bohw", w, normed) + jnp.reshape(b, (1, -1, 1, 1))


if __name__ == "__main__":
    B, C, H, W = 2, 4, 16, 16
    key = jax.random.PRNGKey(0)
    kx, kg, kw, kb = jax.random.split(key, 4)

    x = jax.random.normal(kx, (B, C, H, W), dtype=jnp.float32)
    # LayerNorm gain (non-trivial so the g-folding is actually exercised).
    g = 1.0 + 0.1 * jax.random.normal(kg, (C, 1), dtype=jnp.float32)
    # fn = Conv2d(dim, dim, kernel_size=1): synthetic deterministic weights.
    w = jax.random.normal(kw, (C, C), dtype=jnp.float32) * 0.1
    b = jax.random.normal(kb, (C, 1), dtype=jnp.float32) * 0.1

    ref = prenorm_ref(x, g, w, b)

    # f32-MXU path; max_tile_hw=128 forces >1 spatial tile (HW=256 -> 2 tiles)
    # so the tiled/pipelined code path is exercised even at this small shape.
    out = jax.block_until_ready(prenorm(x, g, w, b, max_tile_hw=128))
    assert out.shape == (B, C, H, W)
    assert jnp.allclose(out, ref, atol=1e-4, rtol=1e-4), "f32 path mismatch vs reference"

    # bf16-at-the-dot path (what "auto" selects at production C >= 256).
    out_bf = jax.block_until_ready(
        prenorm(x, g, w, b, max_tile_hw=256, matmul_dtype=jnp.bfloat16))
    assert jnp.allclose(out_bf, ref, atol=3e-2, rtol=3e-2), "bf16-dot path mismatch"

    print("KERNEL_OK")
</pallas_src>

<mosaic_0001>
module attributes {stable_mosaic.version = 11 : i64} {
  func.func @_prenorm_kernel(%arg0: i32, %arg1: i32, %arg2: memref<1x4x128xf32, #tpu.memory_space<vmem>>, %arg3: memref<4x4xf32, #tpu.memory_space<vmem>>, %arg4: memref<4x1xf32, #tpu.memory_space<vmem>>, %arg5: memref<1x4x128xf32, #tpu.memory_space<vmem>>) attributes {dimension_semantics = [#tpu.dimension_semantics<parallel>, #tpu.dimension_semantics<parallel>], iteration_bounds = array<i64: 2, 2>, scalar_prefetch = 0 : i64, scratch_operands = 0 : i64, tpu.core_type = #tpu.core_type<tc>, window_params = [{transform_indices = @transform_0, window_bounds = array<i64: 1, 4, 128>}, {pipeline_mode = #tpu.pipeline_mode<synchronous>, transform_indices = @transform_1, window_bounds = array<i64: 4, 4>}, {pipeline_mode = #tpu.pipeline_mode<synchronous>, transform_indices = @transform_2, window_bounds = array<i64: 4, 1>}, {transform_indices = @transform_3, window_bounds = array<i64: 1, 4, 128>}]} {
    %c0 = arith.constant 0 : index
    %c0_0 = arith.constant 0 : index
    %c0_1 = arith.constant 0 : index
    %0 = vector.load %arg2[%c0, %c0_0, %c0_1] : memref<1x4x128xf32, #tpu.memory_space<vmem>>, vector<1x4x128xf32>
    %1 = vector.shape_cast %0 : vector<1x4x128xf32> to vector<4x128xf32>
    %cst = arith.constant dense<0.000000e+00> : vector<128xf32>
    %2 = vector.multi_reduction <add>, %1, %cst [0] : vector<4x128xf32> to vector<128xf32>
    %3 = vector.shape_cast %2 : vector<128xf32> to vector<1x128xf32>
    %4 = arith.mulf %1, %1 : vector<4x128xf32>
    %cst_2 = arith.constant dense<0.000000e+00> : vector<128xf32>
    %5 = vector.multi_reduction <add>, %4, %cst_2 [0] : vector<4x128xf32> to vector<128xf32>
    %6 = vector.shape_cast %5 : vector<128xf32> to vector<1x128xf32>
    %cst_3 = arith.constant 2.500000e-01 : f32
    %7 = vector.broadcast %cst_3 : f32 to vector<1x128xf32>
    %8 = arith.mulf %3, %7 : vector<1x128xf32>
    %cst_4 = arith.constant 2.500000e-01 : f32
    %9 = vector.broadcast %cst_4 : f32 to vector<1x128xf32>
    %10 = arith.mulf %6, %9 : vector<1x128xf32>
    %11 = arith.mulf %8, %8 : vector<1x128xf32>
    %12 = arith.subf %10, %11 : vector<1x128xf32>
    %cst_5 = arith.constant 0.000000e+00 : f32
    %13 = vector.broadcast %cst_5 : f32 to vector<1x128xf32>
    %14 = arith.maximumf %12, %13 : vector<1x128xf32>
    %15 = vector.broadcast %8 : vector<1x128xf32> to vector<4x128xf32>
    %16 = arith.subf %1, %15 : vector<4x128xf32>
    %cst_6 = arith.constant 9.99999974E-6 : f32
    %17 = vector.broadcast %cst_6 : f32 to vector<1x128xf32>
    %18 = arith.addf %14, %17 : vector<1x128xf32>
    %19 = math.rsqrt %18 : vector<1x128xf32>
    %20 = vector.broadcast %19 : vector<1x128xf32> to vector<4x128xf32>
    %21 = arith.mulf %16, %20 : vector<4x128xf32>
    %c0_7 = arith.constant 0 : index
    %c0_8 = arith.constant 0 : index
    %22 = vector.load %arg3[%c0_7, %c0_8] : memref<4x4xf32, #tpu.memory_space<vmem>>, vector<4x4xf32>
    %cst_9 = arith.constant dense<0.000000e+00> : vector<4x128xf32>
    %23 = tpu.matmul %22, %21, %cst_9 {dimension_numbers = #tpu.dot_dimension_numbers<[1], [0], [0], [1], [0, 0, 1, 1], [], []>} : vector<4x4xf32>, vector<4x128xf32>, vector<4x128xf32> -> vector<4x128xf32>
    %c0_10 = arith.constant 0 : index
    %c0_11 = arith.constant 0 : index
    %24 = vector.load %arg4[%c0_10, %c0_11] : memref<4x1xf32, #tpu.memory_space<vmem>>, vector<4x1xf32>
    %25 = vector.broadcast %24 : vector<4x1xf32> to vector<4x128xf32>
    %26 = arith.addf %23, %25 : vector<4x128xf32>
    %c0_12 = arith.constant 0 : index
    %c0_13 = arith.constant 0 : index
    %c0_14 = arith.constant 0 : index
    %27 = vector.load %arg5[%c0_12, %c0_13, %c0_14] : memref<1x4x128xf32, #tpu.memory_space<vmem>>, vector<1x4x128xf32>
    %28 = vector.shape_cast %27 : vector<1x4x128xf32> to vector<4x128xf32>
    %29 = vector.shape_cast %26 : vector<4x128xf32> to vector<1x4x128xf32>
    tpu.vector_store %arg5[%c0_12, %c0_13, %c0_14], %29 {strides = array<i32>} : memref<1x4x128xf32, #tpu.memory_space<vmem>>, vector<1x4x128xf32>,
    return
  }
  func.func @transform_0(%arg0: i32, %arg1: i32) -> (i32, i32, i32) {
    %c0_i32 = arith.constant 0 : i32
    %c0_i32_0 = arith.constant 0 : i32
    return %arg0, %c0_i32, %arg1 : i32, i32, i32
  }
  func.func @transform_1(%arg0: i32, %arg1: i32) -> (i32, i32) {
    %c0_i32 = arith.constant 0 : i32
    %c0_i32_0 = arith.constant 0 : i32
    %c0_i32_1 = arith.constant 0 : i32
    return %c0_i32, %c0_i32_0 : i32, i32
  }
  func.func @transform_2(%arg0: i32, %arg1: i32) -> (i32, i32) {
    %c0_i32 = arith.constant 0 : i32
    %c0_i32_0 = arith.constant 0 : i32
    %c0_i32_1 = arith.constant 0 : i32
    return %c0_i32, %c0_i32_0 : i32, i32
  }
  func.func @transform_3(%arg0: i32, %arg1: i32) -> (i32, i32, i32) {
    %c0_i32 = arith.constant 0 : i32
    %c0_i32_0 = arith.constant 0 : i32
    return %arg0, %c0_i32, %arg1 : i32, i32, i32
  }
}

</mosaic_0001>

<bundles_post_ra>
// kernel: tpu_custom_call.1
= control target key start
LH: loop header
LB: loop body
LE: loop exit
PB: predicated region body
PF: predicated region fallthrough
CT: control target
= control target key end

     0   :  { %8 = vsyncpa [#allocation3], 0  ;;  %s886_s0 = inlined_call_operand.hbm [shape: f32[2,4,256], index: 0, kind: input, shape index: {}]   ;;  %s887_s1 = inlined_call_operand.vmem [shape: f32[4,4], index: 1, kind: input, shape index: {}]   ;;  %s888_s2 = inlined_call_operand.vmem [shape: f32[4,1], index: 2, kind: input, shape index: {}]   ;;  %s889_s3 = inlined_call_operand.hbm [shape: f32[2,4,256], index: 3, kind: output, shape index: {}]  }
   0x1   :  { %10 = vsyncpa [#allocation3 + $0x1], 0 }
   0x2   :  { %11 = vsyncpa [#allocation4], 0 }
   0x3   :  { %13 = vsyncpa [#allocation4 + $0x1], 0  ;;  %s679_s12 = smov 0   ;;  %s681_s13 = smov 0  }
   0x4   :  { %s683_s14 = smov 0   ;;  %s685_s15 = smov 0  }
   0x5   :  { %s687_s16 = smov 0   ;;  %s689_s17 = smov 0  }
   0x6   :  { %s691_s18 = smov 0   ;;  %s693_s19 = smov 0  }
   0x7 LB: > { %s416_s20 = sadd.s32 4294967295, %s652_s19   ;;  %s417_s21 = sadd.s32 4294967294, %s652_s19   ;;  %s652_s19 = sphi %s693_s19, %s19_s19   ;;  %s648_s18 = sphi %s691_s18, %s906_s18   ;;  %s644_s17 = sphi %s689_s17, %s905_s17   ;;  %s640_s16 = sphi %s687_s16, %s904_s16   ;;  %s636_s15 = sphi %s685_s15, %s903_s15   ;;  %s632_s14 = sphi %s683_s14, %s902_s14   ;;  %s628_s13 = sphi %s681_s13, %s901_s13   ;;  %s624_s12 = sphi %s679_s12, %s900_s12  }
   0x8   : > { %s28_s22 = sadd.s32 1, %s644_s17  ;;  %s31_s23 = sadd.s32 1, %s648_s18 }
   0x9   : > { %p29_p0 = scmp.ge.s32.totalorder %s28_s22, 2  ;;  %s40_s24 = sadd.s32 1, %s632_s14 }
   0xa   : > { %p47_p1 = scmp.ne.s32.totalorder %s632_s14, %s628_s13  ;;  %p48_p2 = scmp.eq.s32.totalorder %s652_s19, 0 }
   0xb   : > { %s908_s22 = smov (%p29_p0, %s28_s22), 0  ;;  %s910_s23 = smov (!%p29_p0, %s31_s23), %s648_s18 }
   0xc   : > { %s36_s25 = ssub.s32 %s644_s17, %s908_s22  ;;  %p732_p3 = por %p48_p2, %p47_p1 }
   0xd   : > { %p33_p4 = scmp.ge.s32.totalorder %s910_s23, 2  ;;  %p53_p5 = scmp.ne.s32.totalorder %s628_s13, %s624_s12 }
   0xe   : > { %p54_p6 = scmp.eq.s32.totalorder %s416_s20, 0  ;;  %p121_p7 = scmp.eq.s32.totalorder %s416_s20, 3 }
   0xf   : > { %s912_s23 = smov (%p33_p4, %s910_s23), 0  ;;  %p127_p10 = scmp.eq.s32.totalorder %s417_s21, 3 }
  0x10   : > { %p740_p8 = por %p54_p6, %p53_p5  ;;  %p744_p9 = por %p121_p7, %p47_p1 }
  0x11   : > { %s35_s29 = ssub.s32 %s648_s18, %s912_s23  ;;  %p750_p12 = por %p127_p10, %p53_p5 }
  0x12   : > { %s893_s28 = scalar_select %p744_p9, 1, 0 }
  0x13   : > { %s37_s30 = sor.u32 %s36_s25, %s35_s29  ;;  %p452_p13 = scmp.lt.s32.totalorder %s652_s19, 4 }
  0x14   : > { %p38_p11 = scmp.eq.s32.totalorder %s37_s30, 0  ;;  %s153_s5 = sand.u32 1, %s632_s14  }
  0x15   : > { %s894_s4 = scalar_select %p750_p12, 1, 0 }
  0x16   : > { %s757_s6 = scalar_select %p38_p11, %s632_s14, %s40_s24  }
  0x17   : > { %s420_s7 = sshll.u32 %s153_s5, 2  ;;  %s421_s8 = sshll.u32 %s648_s18, 1 }
  0x18   : > { %s162_s9 = sadd.s32 %s644_s17, %s421_s8  ;;  %s157_s10 = scalar_lea.vmem [#allocation2], %s420_s7 }
  0x19   : > { %s166_s11 = sshll.u32 %s157_s10, 4  ;;  %s422_s20 = sshll.u32 %s162_s9, 6  ;;  %s761_s11 = int_to_ptr.vmem [resolvable:$true] %s166_s11 }
  0x1a   : > { %s766_s29 = scalar_lea.hbm %s886_s0, %s422_s20  ;;  %p770_p0 = pnand %p452_p13, %p732_p3 }
  0x1b   : > { %s154_s30 = scalar_lea.sflag [#allocation3], %s153_s5  ;;  %s524_s7 = scalar_lea.hbm %s766_s29, 64 }
  0x1c   : > { %p525_p4 = scmp.ne.s32.totalorder %s766_s29, %s524_s7  ;;  %p526_p5 = pneg %p770_p0 }
  0x1d   : > { %s529_s9 = scalar_lea.hbm %s886_s0, 256  ;;  %p530_p3 = scmp.lt.u32.totalorder %s766_s29, %s886_s0 }
  0x1e   : > { %p527_p6 = pnand %p526_p5, %p525_p4  ;;  %p531_p10 = scmp.lt.u32.totalorder %s529_s9, %s524_s7 }
  0x1f   : > { %p533_p13 = scmp.lt.u32.totalorder %s524_s7, %s766_s29 }
  0x20   : > { %p528_p7 = pneg %p527_p6  ;;  %p532_p11 = por %p531_p10, %p530_p3 }
  0x22   : > { %p534_p1 = por %p533_p13, %p532_p11 }
  0x24   : > { %p535_p2 = pnand %p534_p1, %p528_p7 }
  0x26   : > { %538 = shalt.err (!%p535_p2)
}
  0x27   : > { %s539_s5 = scalar_lea.vmem %s761_s11, 64  ;;  %s654_s21 = smov [#allocation2]  }
  0x28   : > { %p540_p4 = scmp.ne.s32.totalorder %s761_s11, %s539_s5  ;;  %s544_s25 = sshll.u32 %s654_s21, 4  ;;  %s545_s25 = int_to_ptr.vmem [resolvable:$false] %s544_s25 }
  0x29   : > { %s546_s26 = scalar_lea.vmem %s545_s25, 128  ;;  %p547_p9 = scmp.lt.s32.totalorder %s761_s11, %s545_s25 }
  0x2a   : > { %p542_p6 = pnand %p540_p4, %p526_p5  ;;  %p548_p3 = scmp.lt.s32.totalorder %s546_s26, %s539_s5 }
  0x2c   : > { %p543_p12 = pneg %p542_p6  ;;  %p549_p10 = por %p548_p3, %p547_p9 }
  0x2e   : > { %p550_p11 = pnand %p549_p10, %p543_p12 }
  0x30   : > { %553 = shalt.err (!%p550_p11)
}
  0x31   : > { %447 = dma.hbm_to_vmem [thread:$0]  (!%p770_p0), %s766_s29, 64, %s761_s11, %s154_s30  }
  0x32   : > { %p896_p1 = scmp.lt.s32.totalorder %s652_s19, 5  ;;  %p897_p2 = scmp.ge.s32.totalorder %s652_s19, 1 }
  0x34   : > { %p172_p5 = pnand %p897_p2, %p896_p1 }
  0x35   : > { %s806_s7 = sand.u32 (!%p172_p5), 1, %s628_s13  }
  0x36   : > { %175 = sbr.rel (%p172_p5) target bundleno = 329 (0x149), region = 32  ;;  %s424_s8 = sshll.u32 (!%p172_p5), %s806_s7, 2 }
  0x37   : > { %s178_s9 = scalar_lea.sflag (!%p172_p5), [#allocation3], %s806_s7  ;;  %s181_s24 = scalar_lea.vmem (!%p172_p5), [#allocation2], %s424_s8 }
  0x3d   : > { %615 = dma.done.wait (%p740_p8), %s178_s9, 64  }
  0x3e   : > { %617 = vsyncadd (%p740_p8), %s178_s9, 4294967232  ;;  %v655_v0 = vmov 0.0   ;;  %vm656_vm0 = vmmov 0   ;;  %v657_v1 = vmov 0   ;;  %vm205_vm1 = vcmask 1043456   ;;  %s429_s10 = sshll.u32 %s640_s16, 1 }
  0x3f   : > { %435 = vmatprep.subr.mxu0 %v655_v0  ;;  %437 = vmatprep.mubr.msk.f32.mxu0 %vm656_vm0, %v655_v0  ;;  %v204_v2 = vld [vmem:[%s181_s24] sm:$0xf]  ;;  %vm237_vm2 = vcmask 31744   ;;  %s327_s20 = sadd.s32 %s636_s15, %s429_s10  ;;  %s203_s21 = scalar_lea.vmem [#allocation5], %s424_s8 }
  0x40   : > { %521 = vset.pattern.permute.xlu0 %v657_v1  ;;  %v231_v3 = vld [vmem:[%s888_s2] sm:$0xf]  ;;  %v206_v4 = vsel %vm205_vm1, %v204_v2, 0.0  ;;  %v213_v5 = vmul.f32 %v204_v2, %v204_v2  ;;  %s430_s5 = sshll.u32 %s327_s20, 6  ;;  %s331_s25 = sshll.u32 %s203_s21, 4  ;;  %s834_s25 = int_to_ptr.vmem [resolvable:$true] %s331_s25 }
  0x41   : > { %234 = vperm.xlu0 %521, %v231_v3   ;;  %v207_v6 = vrot.slane %v206_v4, 4  ;;  %v230_v28 = vld [vmem:[%s887_s1] sm:$0xf]  ;;  %s832_s24 = scalar_lea.hbm %s889_s3, %s430_s5  ;;  %s316_s15 = scalar_lea.sflag [#allocation4], %s806_s7 }
  0x42   : > { %v214_v7 = vsel %vm205_vm1, %v213_v5, 0.0  ;;  %s554_s16 = scalar_lea.vmem %s834_s25, 64  ;;  %p898_p9 = scmp.ne.s32.totalorder %s893_s28, 0 }
  0x43   : > { %v208_v8 = vadd.f32 %v207_v6, %v206_v4  ;;  %v215_v9 = vrot.slane %v214_v7, 4  ;;  %p555_p8 = scmp.ne.s32.totalorder %s834_s25, %s554_s16  ;;  %s658_s8 = smov [#allocation5]  }
  0x44   : > { %s558_s11 = sshll.u32 %s658_s8, 4  ;;  %s559_s11 = int_to_ptr.vmem [resolvable:$false] %s558_s11 }
  0x45   : > { %v209_v10 = vrot.slane %v208_v8, 2  ;;  %v216_v11 = vadd.f32 %v215_v9, %v214_v7  ;;  %p556_p12 = pnand %p555_p8, %p898_p9  ;;  %s560_s29 = scalar_lea.vmem %s559_s11, 128 }
  0x46   : > { %p561_p7 = scmp.lt.s32.totalorder %s834_s25, %s559_s11  ;;  %p562_p13 = scmp.lt.s32.totalorder %s560_s29, %s554_s16 }
  0x47   : > { %v210_v12 = vadd.f32 %v209_v10, %v208_v8  ;;  %v217_v13 = vrot.slane %v216_v11, 2  ;;  %p557_p0 = pneg %p556_p12 }
  0x48   : > { %p563_p4 = por %p562_p13, %p561_p7 }
  0x49   : > { %v211_v14 = vrot.slane %v210_v12, 1  ;;  %v218_v15 = vadd.f32 %v217_v13, %v216_v11 }
  0x4a   : > { %p564_p6 = pnand %p563_p4, %p557_p0 }
  0x4b   : > { %v212_v16 = vadd.f32 %v211_v14, %v210_v12  ;;  %v219_v17 = vrot.slane %v218_v15, 1 }
  0x4d   : > { %v220_v18 = vadd.f32 %v219_v17, %v218_v15  ;;  %v221_v19 = vmul.f32 0.25, %v212_v16 }
  0x4f   : > { %v222_v20 = vmul.f32 0.25, %v220_v18  ;;  %v223_v21 = vmul.f32 %v221_v19, %v221_v19  ;;  %v226_v25 = vsub.f32 %v204_v2, %v221_v19 }
  0x51   : > { %v224_v22 = vsub.f32 %v222_v20, %v223_v21 }
  0x53   : > { %v225_v23 = vmax.f32 %v224_v22, 0.0 }
  0x55   : > { %v227_v24 = vadd.f32 1e-05, %v225_v23 }
  0x57   : > { %522 = vrsqrt.f32 %v227_v24 }
  0x61   : > { %v523_v26 = vpop.eup %522 }
  0x62   : > { %v229_v27 = vmul.f32 %v523_v26, %v226_v25 }
  0x64   : > { %436 = vmatpush3.msk.msra.mxu0 %vm205_vm1, %v229_v27 }
  0x65   : > { %438 = vmatmul.mubr.msk.f32.vlgmr.msra.gmra.mrb[0].mxu0 %vm237_vm2, %v230_v28 }
  0xc0   : > { %v235_v29 = vpop.permute.xlu0 %234 }
 0x138   : > { %v310_v30 = vpop.f32.mrb[0].mxu0 }
 0x139   : > { %v311_v31 = vadd.f32 %v310_v30, %v235_v29  ;;  %v439_v32 = vpop.f32.mrb[1].mxu0 }
 0x13b   : > { %314 = vst [vmem:[%s203_s21] sm:$0xf] %v311_v31 }
 0x13c   : > { %567 = shalt.err (!%p564_p6)
}
 0x13d   : > { %s568_s7 = scalar_lea.hbm %s832_s24, 64  ;;  %s572_s10 = scalar_lea.hbm %s889_s3, 256 }
 0x13e   : > { %p569_p3 = scmp.ne.s32.totalorder %s832_s24, %s568_s7  ;;  %p573_p1 = scmp.lt.u32.totalorder %s832_s24, %s889_s3 }
 0x13f   : > { %p574_p2 = scmp.lt.u32.totalorder %s572_s10, %s568_s7  ;;  %p576_p8 = scmp.lt.u32.totalorder %s568_s7, %s832_s24 }
 0x140   : > { %p570_p10 = pnand %p569_p3, %p898_p9 }
 0x141   : > { %p575_p5 = por %p574_p2, %p573_p1 }
 0x142   : > { %p571_p11 = pneg %p570_p10 }
 0x143   : > { %p577_p12 = por %p576_p8, %p575_p5 }
 0x145   : > { %p578_p0 = pnand %p577_p12, %p571_p11 }
 0x147   : > { %581 = shalt.err (!%p578_p0)
}
 0x148   : > { %442 = dma.vmem_to_hbm [thread:$0]  (%p898_p9), %s834_s25, 64, %s832_s24, %s316_s15  }
 0x149 PF: > { %p453_p7 = scmp.ge.s32.totalorder %s652_s19, 2  ;;  %s343_s21 = sand.u32 1, %s624_s12  }
 0x14a   : > { %p899_p13 = scmp.ne.s32.totalorder %s894_s4, 0  ;;  %s344_s26 = scalar_lea.sflag [#allocation4], %s343_s21 }
 0x14c   : > { %p449_p4 = pnand %p453_p7, %p899_p13 }
 0x14e   : > { %619 = dma.done.wait (!%p449_p4), %s344_s26, 64  }
 0x14f   : > { %621 = vsyncadd (!%p449_p4), %s344_s26, 4294967232  ;;  %s19_s19 = sadd.s32 1, %s652_s19   ;;  %s900_s12 = smov %s628_s13 }
 0x150   : > { %p16_p6 = scmp.ge.s32.totalorder %s19_s19, 6   ;;  %s901_s13 = smov %s632_s14 }
 0x151   : > { %s902_s14 = smov %s757_s6  ;;  %s903_s15 = smov %s644_s17 }
 0x152   : > { %s904_s16 = smov %s648_s18  ;;  %s905_s17 = smov %s908_s22 }
 0x153   : > { %s906_s18 = smov %s912_s23  ;;  %18 = sbr.rel (!%p16_p6) target bundleno = 7 (0x7), region = 77 }
 0x15a   :  { %349 = vsyncpa [#allocation3], 1 }
 0x15b   :  { %351 = vsyncpa [#allocation3 + $0x1], 1 }
 0x15c   :  { %352 = vsyncpa [#allocation4], 1 }
 0x15d   :  { %354 = vsyncpa [#allocation4 + $0x1], 1 }

</bundles_post_ra>
